<compile_context>
chip_gen: v7x
topology: tpu7x:2x2x1
jax: 0.10.0
libtpu: 0.0.40
codegen_flags: <defaults>
</compile_context>

<pallas_src>
import jax
import jax.numpy as jnp
from jax.experimental import pallas as pl
from jax.experimental.pallas import tpu as pltpu


def _ceil_to(v, m):
    return -(-v // m) * m


def _vmem_capacity_bytes():
    """Physical VMEM of the current TPU generation (conservative fallback: 64 MiB)."""
    try:
        info = pltpu.get_tpu_info()
        cap = getattr(info, "vmem_capacity_bytes", None)
        if cap:
            return int(cap)
    except Exception:
        pass
    return 64 * 1024 * 1024  # v7x per-TensorCore VMEM — safe on every generation


def _vmem_bytes_per_batch_elem(N, D, isz):
    """Approximate VMEM bytes one batch element costs inside the kernel (with padding)."""
    n_sub, n_lane, d_lane = _ceil_to(N, 8), _ceil_to(N, 128), _ceil_to(D, 128)
    x_tile = 2 * n_sub * n_lane * isz          # per-layer attention tile, double-buffered
    seed = 2 * 8 * n_lane * 4                  # (1, N) fp32 seed block (sublane-padded), x2
    feat_buf = n_sub * d_lane * isz            # manual single-buffered feature tile
    cls = 8 * n_lane * 4                       # fp32 CLS carry scratch
    out_blk = 2 * 8 * d_lane * 4               # fp32 output block, double-buffered
    return x_tile + seed + feat_buf + cls + out_blk


def _make_kernel(chain_steps, tb, N, D):
    n_grid_l = max(chain_steps, 1)

    def kernel(seed_ref, x_ref, feat_hbm, out_ref, cls_ref, feat_buf, feat_sem):
        # seed_ref: (tb, 1, N)  fp32 CLS row of layer L-1 for this batch tile
        # x_ref:    (1, tb, N, N) attention maps of layer (L-2-l)
        # feat_hbm: (B, N, D)  token features, left in HBM (manual DMA)
        # out_ref:  (tb, 1, D) fp32 output block
        # cls_ref:  (tb, 1, N) fp32 scratch carrying the CLS row across layer steps
        # feat_buf: (tb, N, D) single-buffered VMEM landing zone for the features
        b = pl.program_id(0)
        l = pl.program_id(1)

        feat_copy = pltpu.make_async_copy(
            feat_hbm.at[pl.ds(b * tb, tb)], feat_buf, feat_sem)

        @pl.when(l == 0)
        def _init():
            # Seed the chain with layer L-1's CLS row and kick off the feature DMA for
            # this batch tile so it overlaps the chain steps below.
            cls_ref[...] = seed_ref[...].astype(jnp.float32)
            feat_copy.start()

        if chain_steps > 0:  # trace-time constant (L >= 2)
            # cls <- cls @ x[L-2-l].  The CLS carry stays fp32 for the whole stack; only
            # the streamed attention tile is in compute_dtype (upcast per tile).
            cls_ref[...] = jnp.einsum(
                "bqn,bnk->bqk", cls_ref[...], x_ref[0].astype(jnp.float32),
                preferred_element_type=jnp.float32)

        # NOTE: traced after the chain update above, so it reads the fully propagated
        # CLS row (stateful ops keep program order).
        @pl.when(l == n_grid_l - 1)
        def _finalize():
            feat_copy.wait()
            feats = jnp.maximum(feat_buf[...], 0)                      # relu, (tb, N, D)
            # Drop the CLS token (token 0) with a narrow (tb, N, 1) mask broadcast over D.
            tok = jax.lax.broadcasted_iota(jnp.int32, (tb, N, 1), 1)
            feats = jnp.where(tok == 0, 0, feats)
            cls = cls_ref[...].astype(feats.dtype)                     # (tb, 1, N)
            out_ref[...] = jnp.einsum(
                "bqn,bnd->bqd", cls, feats,
                preferred_element_type=jnp.float32)                    # (tb, 1, D) fp32

    return kernel


def global_cam(x_stack, features, *, compute_dtype=jnp.bfloat16, tb=None):
    """x_stack: [L, B, N, N], features: [B, N, D] -> [B, 1, D] float32.

    compute_dtype: dtype the big tensors are streamed/multiplied in (bf16 default);
                   the CLS chain carry and all accumulations are always fp32.
    tb:            batch elements per grid step (must divide B); auto-sized from the
                   current TPU generation's VMEM if None.
    """
    L, B, N, N2 = x_stack.shape
    assert N == N2, "attention maps must be square"
    Bf, Nf, D = features.shape
    assert Bf == B and Nf == N, "features must be [B, N, D] matching x"

    # The CLS row of the last layer seeds the chain (tiny, kept fp32), so the full
    # (B, N, N) tile of layer L-1 is never DMA'd into the kernel.
    seed = x_stack[L - 1, :, 0:1, :].astype(jnp.float32)

    x_chain = x_stack.astype(compute_dtype)
    feats_in = features.astype(compute_dtype)

    chain_steps = L - 1
    n_grid_l = max(chain_steps, 1)
    top = max(chain_steps - 1, 0)

    # Per-generation VMEM budget: ~51 MiB on v7x (64 MiB physical), ~100 MiB on
    # v5e/v6e (128 MiB physical).
    vmem_cap = _vmem_capacity_bytes()
    vmem_limit = max(min(int(vmem_cap * 0.8), 100 * 1024 * 1024), 32 * 1024 * 1024)
    budget = vmem_limit - 2 * 1024 * 1024  # headroom for compiler internals

    if tb is None:
        isz = jnp.dtype(compute_dtype).itemsize
        per_elem = _vmem_bytes_per_batch_elem(N, D, isz)
        divisors = [d for d in range(B, 0, -1) if B % d == 0]
        fitting = [d for d in divisors if d * per_elem <= budget] or [1]
        tb = fitting[0]
        # v7x megacore: keep >= 2 batch tiles so the "parallel" axis can span both
        # TensorCores, as long as the tile does not shrink by more than 2x.
        if B // tb < 2:
            for d in fitting:
                if B // d >= 2 and 2 * d >= tb:
                    tb = d
                    break
    assert B % tb == 0, "tb must divide the batch size"

    out = pl.pallas_call(
        _make_kernel(chain_steps, tb, N, D),
        out_shape=jax.ShapeDtypeStruct((B, 1, D), jnp.float32),
        grid_spec=pltpu.PrefetchScalarGridSpec(
            num_scalar_prefetch=0,
            grid=(B // tb, n_grid_l),
            in_specs=[
                # CLS row of layer L-1: same tiny block for every layer step.
                pl.BlockSpec((tb, 1, N), lambda bi, li: (bi, 0, 0)),
                # One attention layer per step, walked from layer L-2 down to 0
                # (layer L-1 is never selected -> no wasted HBM traffic).
                pl.BlockSpec((1, tb, N, N), lambda bi, li: (top - li, bi, 0, 0)),
                # Features stay in HBM; copied manually once per batch tile.
                pl.BlockSpec(memory_space=pl.ANY),
            ],
            out_specs=pl.BlockSpec((tb, 1, D), lambda bi, li: (bi, 0, 0)),
            scratch_shapes=[
                pltpu.VMEM((tb, 1, N), jnp.float32),        # fp32 CLS carry
                pltpu.VMEM((tb, N, D), feats_in.dtype),     # single-buffered features
                pltpu.SemaphoreType.DMA(()),                # feature-copy semaphore
            ],
        ),
        compiler_params=pltpu.CompilerParams(
            dimension_semantics=("parallel", "arbitrary"),
            vmem_limit_bytes=vmem_limit,
        ),
    )(seed, x_chain, feats_in)
    return out


def _reference(x_stack, features):
    # Pure-JAX reference mirroring the PyTorch forward exactly (fp32 throughout).
    L = x_stack.shape[0]
    last_map = x_stack[0].astype(jnp.float32)
    for i in range(1, L):
        last_map = jnp.einsum("bij,bjk->bik",
                              x_stack[i].astype(jnp.float32), last_map)
    last_map1 = last_map[:, 0, 1:][:, None, :]                   # [B, 1, N-1]
    feats = jax.nn.relu(features[:, 1:].astype(jnp.float32))     # [B, N-1, D]
    return jnp.einsum("bij,bjk->bik", last_map1, feats)          # [B, 1, D]


if __name__ == "__main__":
    key = jax.random.PRNGKey(0)
    # 3 attention layers, batch 2, 16 tokens (1 CLS + 15 patches), 128-dim features
    # (D a multiple of 128 -> lane-dense feature/output tiles).
    L, B, N, D = 3, 2, 16, 128

    k1, k2 = jax.random.split(key)
    logits = jax.random.normal(k1, (L, B, N, N), dtype=jnp.float32)
    x_stack = jax.nn.softmax(logits, axis=-1)        # attention-map-like inputs
    features = jax.random.normal(k2, (B, N, D), dtype=jnp.float32)

    ref = _reference(x_stack, features)

    out = jax.block_until_ready(global_cam(x_stack, features))   # bf16 streaming path
    assert out.shape == (B, 1, D)
    assert jnp.allclose(out, ref, atol=5e-2, rtol=5e-2), "mismatch vs reference (bf16 path)"

    # Exact fp32 path must match tightly.
    out_fp32 = jax.block_until_ready(
        global_cam(x_stack, features, compute_dtype=jnp.float32))
    assert jnp.allclose(out_fp32, ref, atol=1e-4, rtol=1e-4), "mismatch vs reference (fp32 path)"

    print("KERNEL_OK")
</pallas_src>

<mosaic_0001>
module attributes {stable_mosaic.version = 11 : i64} {
  func.func @kernel(%arg0: i32, %arg1: i32, %arg2: memref<1x1x16xf32, #tpu.memory_space<vmem>>, %arg3: memref<1x1x16x16xbf16, #tpu.memory_space<vmem>>, %arg4: memref<2x16x128xbf16, #tpu.memory_space<any>>, %arg5: memref<1x1x128xf32, #tpu.memory_space<vmem>>, %arg6: memref<1x1x16xf32, #tpu.memory_space<vmem>>, %arg7: memref<1x16x128xbf16, #tpu.memory_space<vmem>>, %arg8: memref<!tpu.dma_semaphore, #tpu.memory_space<semaphore_mem>>) attributes {dimension_semantics = [#tpu.dimension_semantics<parallel>, #tpu.dimension_semantics<arbitrary>], iteration_bounds = array<i64: 2, 2>, scalar_prefetch = 0 : i64, scratch_operands = 3 : i64, tpu.core_type = #tpu.core_type<tc>, window_params = [{transform_indices = @transform_0, window_bounds = array<i64: 1, 1, 16>}, {transform_indices = @transform_1, window_bounds = array<i64: 1, 1, 16, 16>}, {}, {transform_indices = @transform_3, window_bounds = array<i64: 1, 1, 128>}]} {
    %c1_i32 = arith.constant 1 : i32
    %0 = arith.muli %arg0, %c1_i32 : i32
    %c0_i32 = arith.constant 0 : i32
    %1 = arith.cmpi eq, %arg1, %c0_i32 : i32
    %2 = arith.extui %1 : i1 to i32
    %c0_i32_0 = arith.constant 0 : i32
    %3 = arith.cmpi ne, %2, %c0_i32_0 : i32
    scf.if %3 {
      %c0_12 = arith.constant 0 : index
      %c0_13 = arith.constant 0 : index
      %c0_14 = arith.constant 0 : index
      %13 = vector.load %arg2[%c0_12, %c0_13, %c0_14] : memref<1x1x16xf32, #tpu.memory_space<vmem>>, vector<1x1x16xf32>
      %c0_15 = arith.constant 0 : index
      %c0_16 = arith.constant 0 : index
      %c0_17 = arith.constant 0 : index
      %14 = vector.load %arg6[%c0_15, %c0_16, %c0_17] : memref<1x1x16xf32, #tpu.memory_space<vmem>>, vector<1x1x16xf32>
      tpu.vector_store %arg6[%c0_15, %c0_16, %c0_17], %13 {strides = array<i32>} : memref<1x1x16xf32, #tpu.memory_space<vmem>>, vector<1x1x16xf32>,
      %c0_i32_18 = arith.constant 0 : i32
      %c0_i32_19 = arith.constant 0 : i32
      %15 = tpu.memref_slice %arg4[%0, %c0_i32_18, %c0_i32_19] : memref<2x16x128xbf16, #tpu.memory_space<any>> -> memref<1x16x128xbf16, #tpu.memory_space<any>>
      tpu.enqueue_dma source(%15 : memref<1x16x128xbf16, #tpu.memory_space<any>>) target(%arg7 : memref<1x16x128xbf16, #tpu.memory_space<vmem>>) target_semaphore(%arg8 : memref<!tpu.dma_semaphore, #tpu.memory_space<semaphore_mem>>)
    } else {
    }
    %c0 = arith.constant 0 : index
    %c0_1 = arith.constant 0 : index
    %c0_2 = arith.constant 0 : index
    %4 = vector.load %arg6[%c0, %c0_1, %c0_2] : memref<1x1x16xf32, #tpu.memory_space<vmem>>, vector<1x1x16xf32>
    %c0_3 = arith.constant 0 : index
    %c0_4 = arith.constant 0 : index
    %c0_5 = arith.constant 0 : index
    %c0_6 = arith.constant 0 : index
    %5 = vector.load %arg3[%c0_3, %c0_4, %c0_5, %c0_6] : memref<1x1x16x16xbf16, #tpu.memory_space<vmem>>, vector<1x1x16x16xbf16>
    %6 = vector.shape_cast %5 : vector<1x1x16x16xbf16> to vector<1x16x16xbf16>
    %7 = arith.extf %6 : vector<1x16x16xbf16> to vector<1x16x16xf32>
    "tpu.trace_start"() <{level = 10 : i32, message = "bqn,bnk->bqk"}> : () -> ()
    %cst = arith.constant dense<0.000000e+00> : vector<1x1x16xf32>
    %8 = tpu.matmul %4, %7, %cst {dimension_numbers = #tpu.dot_dimension_numbers<[2], [1], [1], [2], [0, 0, 0, 1, 1, 2], [0], [0]>} : vector<1x1x16xf32>, vector<1x16x16xf32>, vector<1x1x16xf32> -> vector<1x1x16xf32>
    "tpu.trace_stop"() : () -> ()
    %c0_7 = arith.constant 0 : index
    %c0_8 = arith.constant 0 : index
    %c0_9 = arith.constant 0 : index
    %9 = vector.load %arg6[%c0_7, %c0_8, %c0_9] : memref<1x1x16xf32, #tpu.memory_space<vmem>>, vector<1x1x16xf32>
    tpu.vector_store %arg6[%c0_7, %c0_8, %c0_9], %8 {strides = array<i32>} : memref<1x1x16xf32, #tpu.memory_space<vmem>>, vector<1x1x16xf32>,
    %c1_i32_10 = arith.constant 1 : i32
    %10 = arith.cmpi eq, %arg1, %c1_i32_10 : i32
    %11 = arith.extui %10 : i1 to i32
    %c0_i32_11 = arith.constant 0 : i32
    %12 = arith.cmpi ne, %11, %c0_i32_11 : i32
    scf.if %12 {
      %c0_i32_12 = arith.constant 0 : i32
      %c0_i32_13 = arith.constant 0 : i32
      %13 = tpu.memref_slice %arg4[%0, %c0_i32_12, %c0_i32_13] : memref<2x16x128xbf16, #tpu.memory_space<any>> -> memref<1x16x128xbf16, #tpu.memory_space<any>>
      tpu.wait_dma2 semaphore(%arg8 : memref<!tpu.dma_semaphore, #tpu.memory_space<semaphore_mem>>) src(%13 : memref<1x16x128xbf16, #tpu.memory_space<any>>) dst(%arg7 : memref<1x16x128xbf16, #tpu.memory_space<vmem>>)
      %c0_14 = arith.constant 0 : index
      %c0_15 = arith.constant 0 : index
      %c0_16 = arith.constant 0 : index
      %14 = vector.load %arg7[%c0_14, %c0_15, %c0_16] : memref<1x16x128xbf16, #tpu.memory_space<vmem>>, vector<1x16x128xbf16>
      %cst_17 = arith.constant 0.000000e+00 : bf16
      %15 = vector.broadcast %cst_17 : bf16 to vector<1x16x128xbf16>
      %16 = arith.maximumf %14, %15 : vector<1x16x128xbf16>
      %17 = tpu.iota {dimensions = array<i32: 1>} : vector<1x16x1xi32>
      %c0_i32_18 = arith.constant 0 : i32
      %18 = vector.broadcast %c0_i32_18 : i32 to vector<1x16x1xi32>
      %19 = arith.cmpi eq, %17, %18 : vector<1x16x1xi32>
      %c0_i32_19 = arith.constant 0 : i32
      %20 = arith.sitofp %c0_i32_19 : i32 to bf16
      %21 = vector.shape_cast %19 : vector<1x16x1xi1> to vector<1x16x1xi1>
      %22 = vector.broadcast %21 : vector<1x16x1xi1> to vector<1x16x128xi1>
      %23 = vector.broadcast %20 : bf16 to vector<1x16x128xbf16>
      %24 = arith.select %22, %23, %16 : vector<1x16x128xi1>, vector<1x16x128xbf16>
      %c0_20 = arith.constant 0 : index
      %c0_21 = arith.constant 0 : index
      %c0_22 = arith.constant 0 : index
      %25 = vector.load %arg6[%c0_20, %c0_21, %c0_22] : memref<1x1x16xf32, #tpu.memory_space<vmem>>, vector<1x1x16xf32>
      %26 = arith.truncf %25 : vector<1x1x16xf32> to vector<1x1x16xbf16>
      "tpu.trace_start"() <{level = 10 : i32, message = "bqn,bnd->bqd"}> : () -> ()
      %cst_23 = arith.constant dense<0.000000e+00> : vector<1x1x128xf32>
      %27 = tpu.matmul %26, %24, %cst_23 {dimension_numbers = #tpu.dot_dimension_numbers<[2], [1], [1], [2], [0, 0, 0, 1, 1, 2], [0], [0]>} : vector<1x1x16xbf16>, vector<1x16x128xbf16>, vector<1x1x128xf32> -> vector<1x1x128xf32>
      "tpu.trace_stop"() : () -> ()
      %c0_24 = arith.constant 0 : index
      %c0_25 = arith.constant 0 : index
      %c0_26 = arith.constant 0 : index
      %28 = vector.load %arg5[%c0_24, %c0_25, %c0_26] : memref<1x1x128xf32, #tpu.memory_space<vmem>>, vector<1x1x128xf32>
      tpu.vector_store %arg5[%c0_24, %c0_25, %c0_26], %27 {strides = array<i32>} : memref<1x1x128xf32, #tpu.memory_space<vmem>>, vector<1x1x128xf32>,
    } else {
    }
    return
  }
  func.func @transform_0(%arg0: i32, %arg1: i32) -> (i32, i32, i32) {
    %c0_i32 = arith.constant 0 : i32
    %c0_i32_0 = arith.constant 0 : i32
    %c0_i32_1 = arith.constant 0 : i32
    return %arg0, %c0_i32, %c0_i32_0 : i32, i32, i32
  }
  func.func @transform_1(%arg0: i32, %arg1: i32) -> (i32, i32, i32, i32) {
    %c1_i32 = arith.constant 1 : i32
    %0 = arith.subi %c1_i32, %arg1 : i32
    %c0_i32 = arith.constant 0 : i32
    %c0_i32_0 = arith.constant 0 : i32
    %c0_i32_1 = arith.constant 0 : i32
    return %0, %arg0, %c0_i32, %c0_i32_0 : i32, i32, i32, i32
  }
  func.func @transform_3(%arg0: i32, %arg1: i32) -> (i32, i32, i32) {
    %c0_i32 = arith.constant 0 : i32
    %c0_i32_0 = arith.constant 0 : i32
    %c0_i32_1 = arith.constant 0 : i32
    return %arg0, %c0_i32, %c0_i32_0 : i32, i32, i32
  }
}

</mosaic_0001>

<bundles_post_ra>
// kernel: tpu_custom_call.1
= control target key start
LH: loop header
LB: loop body
LE: loop exit
PB: predicated region body
PF: predicated region fallthrough
CT: control target
= control target key end

     0   :  { %s1235_s0 = inlined_call_operand.hbm [shape: f32[2,1,16], index: 0, kind: input, shape index: {}]   ;;  %s1236_s1 = inlined_call_operand.hbm [shape: bf16[3,2,16,16], index: 1, kind: input, shape index: {}]   ;;  %s1237_s2 = inlined_call_operand.hbm [shape: bf16[2,16,128], index: 2, kind: input, shape index: {}]   ;;  %s1238_s3 = inlined_call_operand.hbm [shape: f32[2,1,128], index: 3, kind: output, shape index: {}]  }
   0x1   :  { %1249 = sst [smem:[#allocation24_spill]] %s1235_s0 }
   0x2   :  { %1250 = sst [smem:[#allocation25_spill]] %s1238_s3 }
   0x3   :  { %8 = vsyncpa [#allocation6], 0 }
   0x4   :  { %10 = vsyncpa [#allocation6 + $0x1], 0 }
   0x5   :  { %11 = vsyncpa [#allocation9], 0 }
   0x6   :  { %13 = vsyncpa [#allocation9 + $0x1], 0 }
   0x7   :  { %14 = vsyncpa [#allocation7], 0 }
   0x8   :  { %16 = vsyncpa [#allocation7 + $0x1], 0  ;;  %s930_s12 = smov 0   ;;  %s932_s13 = smov 0  }
   0x9   :  { %s934_s14 = smov 0   ;;  %s936_s15 = smov 0  }
   0xa   :  { %s938_s16 = smov 0   ;;  %s940_s17 = smov 0  }
   0xb   :  { %s942_s18 = smov 0   ;;  %s944_s19 = smov 0  }
   0xc   :  { %s946_s20 = smov 0   ;;  %s948_s21 = smov 0  }
   0xd   :  { %s950_s22 = smov 0  }
   0xe LB: > { %1251 = sst [smem:[#allocation19_spill]] %s868_s15  ;;  %s517_s23 = sadd.s32 4294967295, %s896_s22   ;;  %s896_s22 = sphi %s950_s22, %s22_s22   ;;  %s892_s21 = sphi %s948_s21, %s1286_s21   ;;  %s888_s20 = sphi %s946_s20, %s1278_s20   ;;  %s884_s19 = sphi %s944_s19, %s1285_s19   ;;  %s880_s18 = sphi %s942_s18, %s1277_s18   ;;  %s876_s17 = sphi %s940_s17, %s1284_s17   ;;  %s872_s16 = sphi %s938_s16, %s1283_s16   ;;  %s868_s15 = sphi %s936_s15, %s1282_s15   ;;  %s864_s14 = sphi %s934_s14, %s1281_s14   ;;  %s860_s13 = sphi %s932_s13, %s1280_s13   ;;  %s856_s12 = sphi %s930_s12, %s1279_s12  }
   0xf   : > { %1252 = sst [smem:[#allocation20_spill]] %s888_s20  ;;  %s518_s24 = sadd.s32 4294967294, %s896_s22  }
  0x10   : > { %1253 = sst [smem:[#allocation21_spill]] %s896_s22  ;;  %s34_s25 = sadd.s32 1, %s892_s21 }
  0x11   : > { %p48_p0 = scmp.ne.s32.totalorder %s876_s17, %s872_s16  ;;  %p49_p1 = scmp.eq.s32.totalorder %s896_s22, 0 }
  0x12   : > { %p54_p2 = scmp.ne.s32.totalorder %s872_s16, %s868_s15  ;;  %p55_p3 = scmp.eq.s32.totalorder %s517_s23, 0 }
  0x13   : > { %p992_p4 = por %p49_p1, %p48_p0  ;;  %p78_p5 = scmp.ne.s32.totalorder %s864_s14, %s860_s13 }
  0x14   : > { %p998_p6 = por %p55_p3, %p54_p2  ;;  %p84_p7 = scmp.ne.s32.totalorder %s860_s13, %s856_s12 }
  0x15   : > { %p1003_p8 = por %p78_p5, %p49_p1  ;;  %p108_p9 = scmp.eq.s32.totalorder %s517_s23, 3 }
  0x16   : > { %s1255_s28 = scalar_select %p998_p6, 1, 0 }
  0x17   : > { %p1007_p10 = por %p84_p7, %p55_p3  ;;  %p114_p11 = scmp.eq.s32.totalorder %s518_s24, 3 }
  0x18   : > { %p1011_p12 = por %p108_p9, %p48_p0  ;;  %p585_p1 = scmp.lt.s32.totalorder %s896_s22, 4 }
  0x19   : > { %s1257_s30 = scalar_select %p1007_p10, 1, 0 }
  0x1a   : > { %s1258_s4 = scalar_select %p1011_p12, 1, 0 }
  0x1b   : > { %p1015_p13 = por %p114_p11, %p54_p2  ;;  %s134_s6 = sand.u32 1, %s876_s17  }
  0x1c   : > { %s521_s7 = sshll.u32 %s892_s21, 4  ;;  %s1261_s0 = sld [smem:[#allocation24_spill]] }
  0x1d   : > { %s1259_s5 = scalar_select %p1015_p13, 1, 0 }
  0x1e   : > { %s137_s11 = scalar_lea.vmem [#allocation5], %s134_s6  ;;  %p1031_p0 = pnand %p585_p1, %p992_p4 }
  0x1f   : > { %1260 = sst [smem:[#allocation22_spill]] %s1259_s5  ;;  %s144_s12 = sshll.u32 %s137_s11, 4  ;;  %s1027_s12 = int_to_ptr.vmem [resolvable:$true] %s144_s12 }
  0x20   : > { %p1037_p2 = pnand %p585_p1, %p1003_p8  ;;  %p686_p9 = pneg %p1031_p0 }
  0x22   : > { %s1025_s10 = scalar_lea.hbm %s1261_s0, %s521_s7  ;;  %s135_s7 = scalar_lea.sflag [#allocation6], %s134_s6 }
  0x23   : > { %s684_s8 = scalar_lea.hbm %s1025_s10, 16  ;;  %s689_s29 = scalar_lea.hbm %s1261_s0, 32 }
  0x24   : > { %p685_p7 = scmp.ne.s32.totalorder %s1025_s10, %s684_s8  ;;  %p690_p8 = scmp.lt.u32.totalorder %s1025_s10, %s1261_s0 }
  0x25   : > { %p691_p1 = scmp.lt.u32.totalorder %s689_s29, %s684_s8  ;;  %p693_p5 = scmp.lt.u32.totalorder %s684_s8, %s1025_s10 }
  0x26   : > { %p687_p4 = pnand %p686_p9, %p685_p7 }
  0x27   : > { %p692_p3 = por %p691_p1, %p690_p8 }
  0x28   : > { %p688_p11 = pneg %p687_p4 }
  0x29   : > { %p694_p13 = por %p693_p5, %p692_p3 }
  0x2b   : > { %p695_p12 = pnand %p694_p13, %p688_p11 }
  0x2d   : > { %698 = shalt.err (!%p695_p12)
}
  0x2e   : > { %s699_s6 = scalar_lea.vmem %s1027_s12, 16  ;;  %s898_s27 = smov [#allocation5]  }
  0x2f   : > { %p700_p7 = scmp.ne.s32.totalorder %s1027_s12, %s699_s6  ;;  %s704_s9 = sshll.u32 %s898_s27, 4  ;;  %s705_s9 = int_to_ptr.vmem [resolvable:$false] %s704_s9 }
  0x30   : > { %s706_s26 = scalar_lea.vmem %s705_s9, 32  ;;  %p707_p6 = scmp.lt.s32.totalorder %s1027_s12, %s705_s9 }
  0x31   : > { %p702_p4 = pnand %p700_p7, %p686_p9  ;;  %p708_p8 = scmp.lt.s32.totalorder %s706_s26, %s699_s6 }
  0x33   : > { %p703_p10 = pneg %p702_p4  ;;  %p709_p1 = por %p708_p8, %p707_p6 }
  0x35   : > { %p710_p3 = pnand %p709_p1, %p703_p10 }
  0x37   : > { %713 = shalt.err (!%p710_p3)
}
  0x38   : > { %577 = dma.hbm_to_vmem [thread:$0]  (!%p1031_p0), %s1025_s10, 16, %s1027_s12, %s135_s7  }
  0x39   : > { %p1264_p12 = scmp.lt.s32.totalorder %s896_s22, 5  ;;  %p1265_p13 = scmp.ge.s32.totalorder %s896_s22, 1 }
  0x3a   : > { %s71_s29 = sadd.s32 1, %s864_s14  ;;  %s151_s23 = sand.u32 1, %s864_s14  }
  0x3b   : > { %p1072_p5 = pnand %p1265_p13, %p1264_p12  ;;  %s31_s11 = sadd.s32 1, %s888_s20 }
  0x3c   : > { %s64_s6 = ssub.s32 1, %s888_s20  ;;  %p32_p6 = scmp.ge.s32.totalorder %s31_s11, 2 }
  0x3d   : > { %s522_s27 = sshll.u32 %s151_s23, 3  ;;  %s523_s9 = sshll.u32 %s892_s21, 1 }
  0x3e   : > { %s1288_s11 = smov (%p32_p6, %s31_s11), 0  ;;  %s1290_s25 = smov (!%p32_p6, %s34_s25), %s892_s21 }
  0x3f   : > { %1267 = sst [smem:[#allocation23_spill]] %s1288_s11  ;;  %s65_s10 = ssub.s32 1, %s1288_s11 }
  0x40   : > { %p36_p10 = scmp.ge.s32.totalorder %s1290_s25, 2  ;;  %s66_s12 = ssub.s32 %s64_s6, %s65_s10 }
  0x41   : > { %s524_s7 = sshll.u32 %s64_s6, 2  ;;  %s155_s26 = scalar_lea.vmem [#allocation8], %s522_s27 }
  0x42   : > { %s165_s0 = sshll.u32 %s155_s26, 4  ;;  %s1292_s25 = smov (%p36_p10, %s1290_s25), 0  ;;  %s1089_s0 = int_to_ptr.vmem [resolvable:$true] %s165_s0 }
  0x43   : > { %s162_s20 = sadd.s32 %s524_s7, %s523_s9  ;;  %s38_s5 = ssub.s32 %s892_s21, %s1292_s25 }
  0x44   : > { %s525_s15 = sshll.u32 %s162_s20, 6  ;;  %p39_p0 = scmp.eq.s32.totalorder %s38_s5, 0 }
  0x45   : > { %s68_s22 = sor.u32 %s66_s12, %s38_s5  ;;  %s1096_s10 = scalar_lea.hbm %s1236_s1, %s525_s15 }
  0x46   : > { %p69_p9 = scmp.eq.s32.totalorder %s68_s22, 0  ;;  %s1268_s6 = sadd.s32 1, %s876_s17 }
  0x47   : > { %s1101_s27 = scalar_select %p39_p0, %s876_s17, %s1268_s6  }
  0x48   : > { %s1104_s9 = scalar_select %p69_p9, %s864_s14, %s71_s29  }
  0x49   : > { %s1106_s7 = scalar_lea.sflag [#allocation9], %s151_s23  ;;  %s714_s20 = scalar_lea.hbm %s1096_s10, 128 }
  0x4a   : > { %p715_p11 = scmp.ne.s32.totalorder %s1096_s10, %s714_s20  ;;  %p716_p7 = pneg %p1037_p2 }
  0x4b   : > { %s719_s22 = scalar_lea.hbm %s1236_s1, 768  ;;  %p720_p1 = scmp.lt.u32.totalorder %s1096_s10, %s1236_s1 }
  0x4c   : > { %p717_p4 = pnand %p716_p7, %p715_p11  ;;  %p721_p3 = scmp.lt.u32.totalorder %s719_s22, %s714_s20 }
  0x4d   : > { %p723_p13 = scmp.lt.u32.totalorder %s714_s20, %s1096_s10 }
  0x4e   : > { %p718_p8 = pneg %p717_p4  ;;  %p722_p12 = por %p721_p3, %p720_p1 }
  0x50   : > { %p724_p6 = por %p723_p13, %p722_p12 }
  0x52   : > { %p725_p10 = pnand %p724_p6, %p718_p8 }
  0x54   : > { %728 = shalt.err (!%p725_p10)
}
  0x55   : > { %s729_s29 = scalar_lea.vmem %s1089_s0, 128  ;;  %s899_s23 = smov [#allocation8]  }
  0x56   : > { %p730_p0 = scmp.ne.s32.totalorder %s1089_s0, %s729_s29  ;;  %s734_s12 = sshll.u32 %s899_s23, 4  ;;  %s735_s12 = int_to_ptr.vmem [resolvable:$false] %s734_s12 }
  0x57   : > { %s736_s26 = scalar_lea.vmem %s735_s12, 256  ;;  %p737_p4 = scmp.lt.s32.totalorder %s1089_s0, %s735_s12 }
  0x58   : > { %p732_p9 = pnand %p730_p0, %p716_p7  ;;  %p738_p1 = scmp.lt.s32.totalorder %s736_s26, %s729_s29 }
  0x5a   : > { %p733_p11 = pneg %p732_p9  ;;  %p739_p3 = por %p738_p1, %p737_p4 }
  0x5c   : > { %p740_p12 = pnand %p739_p3, %p733_p11 }
  0x5e   : > { %743 = shalt.err (!%p740_p12)
}
  0x5f   : > { %s900_s6 = smov 64   ;;  %s901_s20 = smov 4  }
  0x60   : > { %580 = dma.hbm_to_vmem [thread:$0]  (!%p1037_p2), %s1096_s10, 128, %s1089_s0, %s1106_s7, %s900_s6, %s900_s6, %s901_s20  }
  0x61   : > { %177 = sbr.rel (%p1072_p5) target bundleno = 605 (0x25d), region = 28  ;;  %s1137_s3 = sand.u32 (!%p1072_p5), 1, %s872_s16  }
  0x62   : > { %s180_s15 = scalar_lea.sflag (!%p1072_p5), [#allocation6], %s1137_s3  ;;  %s182_s22 = scalar_lea.vmem (!%p1072_p5), [#allocation5], %s1137_s3 }
  0x63   : > { %p1269_p7 = scmp.ne.s32.totalorder (!%p1072_p5), %s1255_s28, 0 }
  0x68   : > { %841 = dma.done.wait (%p1269_p7), %s180_s15, 16  }
  0x69   : > { %843 = vsyncadd (%p1269_p7), %s180_s15, 4294967280  ;;  %s187_s24 = sand.u32 1, %s860_s13   ;;  %p1270_p2 = scmp.ne.s32.totalorder %s1257_s30, 0 }
  0x6a   : > { %s1146_s0 = sshll.u32 %s187_s24, 3  ;;  %s188_s8 = scalar_lea.sflag [#allocation9], %s187_s24 }
  0x6b   : > { %s191_s10 = scalar_lea.vmem [#allocation8], %s1146_s0 }
  0x6c   : > { %845 = dma.done.wait (%p1270_p2), %s188_s8, 128  }
  0x6d   : > { %847 = vsyncadd (%p1270_p2), %s188_s8, 4294967168  ;;  %s214_s7 = scalar_lea.vmem [#allocation10], %s1137_s3  ;;  %p528_p5 = scmp.ne.s32.totalorder %s880_s18, 0 }
  0x6e   : > { %v223_v0 = vld [vmem:[%s182_s22] sm:$0x1] (!%p528_p5)  ;;  %vm224_vm0 = vcmask (!%p528_p5), 122880   ;;  %s541_s28 = sshll.u32 (!%p528_p5), %s884_s19, 7  ;;  %s902_s23 = smov (!%p528_p5), [#allocation3]  }
  0x6f   : > { %222 = sbr.rel (%p528_p5) target bundleno = 132 (0x84), region = 40  ;;  %225 = vst.msk [vmem:[#allocation2] sm:$0x1] (!%p528_p5), %vm224_vm0, %v223_v0  ;;  %s228_s29 = scalar_lea.hbm (!%p528_p5), %s1237_s2, %s541_s28 }
  0x70   : > { %s236_s12 = sshll.u32 (!%p528_p5), %s902_s23, 4  ;;  %s744_s26 = scalar_lea.hbm (!%p528_p5), %s228_s29, 128  ;;  %s237_s12 = int_to_ptr.vmem [resolvable:$true] %s236_s12 }
  0x71   : > { %p745_p8 = scmp.ne.s32.totalorder (!%p528_p5), %s228_s29, %s744_s26  ;;  %s746_s20 = scalar_lea.hbm (!%p528_p5), %s1237_s2, 256 }
  0x72   : > { %p747_p13 = scmp.lt.u32.totalorder (!%p528_p5), %s228_s29, %s1237_s2  ;;  %p748_p6 = scmp.lt.u32.totalorder (!%p528_p5), %s746_s20, %s744_s26 }
  0x73   : > { %p750_p0 = scmp.lt.u32.totalorder (!%p528_p5), %s744_s26, %s228_s29 }
  0x74   : > { %p749_p10 = por (!%p528_p5), %p748_p6, %p747_p13 }
  0x76   : > { %p751_p9 = por %p750_p0, %p749_p10 }
  0x78   : > { %p752_p11 = pnand %p751_p9, %p745_p8 }
  0x7a   : > { %755 = shalt.err (!%p752_p11)  }
  0x7b   : > { %s756_s22 = scalar_lea.vmem %s237_s12, 128  ;;  %p761_p1 = scmp.lt.s32.totalorder %s237_s12, %s237_s12 }
  0x7c   : > { %p757_p4 = scmp.ne.s32.totalorder %s237_s12, %s756_s22  ;;  %p762_p3 = scmp.lt.s32.totalorder %s756_s22, %s756_s22 }
  0x7e   : > { %p763_p12 = por %p762_p3, %p761_p1 }
  0x80   : > { %p764_p7 = pnand %p763_p12, %p757_p4 }
  0x82   : > { %767 = shalt.err (!%p764_p7)  }
  0x83   : > { %239 = dma.hbm_to_vmem [thread:$0]  %s228_s29, 128, %s237_s12, [#allocation4] }
  0x84 PF: > { %v543_v1 = vld [vmem:[%s191_s10] sm:$0xff]   ;;  %v903_v2 = vmov 0.0|0.0   ;;  %vm904_vm1 = vmmov 0   ;;  %v905_v3 = vmov 0.0   ;;  %v240_v4 = vld [vmem:[#allocation2] sm:$0x1] }
  0x85   : > { %565 = vmatprep.subr.bf16.mxu0 %v903_v2  ;;  %556 = vmatprep.mubr.msk.f32.mxu0 %vm904_vm1, %v905_v3  ;;  %vm245_vm2 = vcmask 130048   ;;  %vm319_vm3 = vcmask 122880   ;;  %p532_p2 = scmp.ne.s32.totalorder %s880_s18, 1 }
  0x86   : > { %567 = vmatpush3.bf16.msra.mxu0 %v543_v1 }
  0x89   : > { %557 = vmatmul.mubr.msk.f32.vlgmr.msra.gmra.mrb[0].mxu0 %vm245_vm2, %v240_v4 }
 0x157   : > { %324 = sbr.rel (%p532_p2) target bundleno = 579 (0x243), region = 48 }
 0x15c   : > { %v315_v5 = vpop.f32.mrb[0].mxu0 }
 0x15d   : > { %320 = vst.msk [vmem:[#allocation2] sm:$0x1] %vm319_vm3, %v315_v5  ;;  %v558_v6 = vpop.f32.mrb[1].mxu0 }
 0x15e   : > { %848 = dma.done.wait [#allocation4], 128 }
 0x15f   : > { %849 = vsyncadd [#allocation4], 4294967168  ;;  %v332_v7 = vlaneseq  ;;  %v906_v8 = vmov 0.0   ;;  %vm907_vm4 = vmmov 0   ;;  %v908_v10 = vmov 0   ;;  %v330_v13 = vld [vmem:[#allocation3] sm:$0xff] }
 0x160   : > { %559 = vmatprep.subr.bf16.mxu0 %v906_v8  ;;  %vm342_vm5 = vmpackc.low %vm907_vm4, %vm907_vm4  ;;  %561 = vmatprep.mubr.msk.bf16.mxu0 %vm907_vm4, %v906_v8  ;;  %v331_v16 = vmax.bf16 %v908_v10, %v330_v13 }
 0x161   : > { %v333_v9 = vshrl.u32 %v332_v7, 7  ;;  %v344_v11 = vsel %vm342_vm5, 65537, %v908_v10 }
 0x163   : > { %vm335_vm6 = vcmp.eq.s32.totalorder %v333_v9, 0 }
 0x164   : > { %vm341_vm7 = vmpackc.low %vm335_vm6, %vm335_vm6  ;;  %v350_v15 = vld [vmem:[#allocation2] sm:$0x1] }
 0x165   : > { %v343_v12 = vsel %vm341_vm7, 65537, %v908_v10  ;;  %v351_v17 = vpack.c.bf16 %v350_v15, %v350_v15 }
 0x166   : > { %v533_v14 = vcombine.low %v343_v12, %v344_v11 }
 0x168   : > { %vm546_vm8 = vcmp.eq.s16.totalorder %v533_v14, 0 }
 0x169   : > { %560 = vmatpush3.bf16.msk.msra.mxu0 %vm546_vm8, %v331_v16 }
 0x16c   : > { %562 = vmatmul.mubr.msk.bf16.vlgmr.msra.gmra.mrb[0].mxu0 %vm245_vm2, %v351_v17 }
 0x23f   : > { %v389_v18 = vpop.f32.mrb[0].mxu0 }
 0x240   : > { %395 = vst [vmem:[%s214_s7] sm:$0x1] %v389_v18  ;;  %v563_v19 = vpop.f32.mrb[1].mxu0 }
 0x241   : > { %v392_v20 = vpop.f32.mrb[2].mxu0 }
 0x242   : > { %v564_v21 = vpop.f32.mrb[3].mxu0 }
 0x243 PF: > { %s537_s18 = sshll.u32 %s884_s19, 4  ;;  %s1271_s10 = sld [smem:[#allocation25_spill]] }
 0x244   : > { %s409_s5 = sshll.u32 %s214_s7, 4  ;;  %s397_s11 = scalar_lea.sflag [#allocation7], %s1137_s3  ;;  %s410_s5 = int_to_ptr.vmem [resolvable:$true] %s409_s5 }
 0x245   : > { %s768_s29 = scalar_lea.vmem %s410_s5, 16  ;;  %p1272_p8 = scmp.ne.s32.totalorder %s1258_s4, 0 }
 0x246   : > { %p769_p5 = scmp.ne.s32.totalorder %s410_s5, %s768_s29  ;;  %s909_s23 = smov [#allocation10]  }
 0x247   : > { %s772_s12 = sshll.u32 %s909_s23, 4  ;;  %s773_s12 = int_to_ptr.vmem [resolvable:$false] %s772_s12 }
 0x248   : > { %p770_p13 = pnand %p769_p5, %p1272_p8  ;;  %s774_s26 = scalar_lea.vmem %s773_s12, 32 }
 0x249   : > { %s1176_s28 = scalar_lea.hbm %s1271_s10, %s537_s18  ;;  %p775_p10 = scmp.lt.s32.totalorder %s410_s5, %s773_s12 }
 0x24a   : > { %p771_p6 = pneg %p770_p13  ;;  %p776_p0 = scmp.lt.s32.totalorder %s774_s26, %s768_s29 }
 0x24c   : > { %p777_p9 = por %p776_p0, %p775_p10 }
 0x24e   : > { %p778_p11 = pnand %p777_p9, %p771_p6 }
 0x250   : > { %781 = shalt.err (!%p778_p11)
}
 0x251   : > { %s782_s19 = scalar_lea.hbm %s1176_s28, 16  ;;  %s786_s30 = scalar_lea.hbm %s1271_s10, 32 }
 0x252   : > { %p783_p4 = scmp.ne.s32.totalorder %s1176_s28, %s782_s19  ;;  %p787_p12 = scmp.lt.u32.totalorder %s1176_s28, %s1271_s10 }
 0x253   : > { %p788_p7 = scmp.lt.u32.totalorder %s786_s30, %s782_s19  ;;  %p790_p5 = scmp.lt.u32.totalorder %s782_s19, %s1176_s28 }
 0x254   : > { %p784_p1 = pnand %p783_p4, %p1272_p8 }
 0x255   : > { %p789_p2 = por %p788_p7, %p787_p12 }
 0x256   : > { %p785_p3 = pneg %p784_p1 }
 0x257   : > { %p791_p13 = por %p790_p5, %p789_p2 }
 0x259   : > { %p792_p6 = pnand %p791_p13, %p785_p3 }
 0x25b   : > { %795 = shalt.err (!%p792_p6)
}
 0x25c   : > { %572 = dma.vmem_to_hbm [thread:$0]  (%p1272_p8), %s410_s5, 16, %s1176_s28, %s397_s11  }
 0x25d PF: > { %s1273_s15 = sld [smem:[#allocation21_spill]]  ;;  %s1274_s24 = sld [smem:[#allocation19_spill]] }
 0x25e   : > { %s1275_s22 = sld [smem:[#allocation22_spill]] }
 0x263   : > { %p586_p10 = scmp.ge.s32.totalorder %s1273_s15, 2  ;;  %s421_s18 = sand.u32 1, %s1274_s24  }
 0x264   : > { %p1276_p0 = scmp.ne.s32.totalorder %s1275_s22, 0  ;;  %s422_s0 = scalar_lea.sflag [#allocation7], %s421_s18 }
 0x266   : > { %p582_p9 = pnand %p586_p10, %p1276_p0 }
 0x268   : > { %851 = dma.done.wait (!%p582_p9), %s422_s0, 16  }
 0x269   : > { %853 = vsyncadd (!%p582_p9), %s422_s0, 4294967280  ;;  %s22_s22 = sadd.s32 1, %s1273_s15   ;;  %s1277_s18 = sld [smem:[#allocation20_spill]] }
 0x26a   : > { %p19_p11 = scmp.ge.s32.totalorder %s22_s22, 6   ;;  %s1278_s20 = sld [smem:[#allocation23_spill]] }
 0x26b   : > { %s1279_s12 = smov %s860_s13  ;;  %s1280_s13 = smov %s864_s14 }
 0x26c   : > { %s1281_s14 = smov %s1104_s9  ;;  %s1282_s15 = smov %s872_s16 }
 0x26d   : > { %s1283_s16 = smov %s876_s17  ;;  %s1284_s17 = smov %s1101_s27 }
 0x26e   : > { %s1285_s19 = smov %s892_s21  ;;  %s1286_s21 = smov %s1292_s25 }
 0x26f   :  { %21 = sbr.rel (!%p19_p11) target bundleno = 14 (0xe), region = 99 }
 0x276   :  { %426 = vsyncpa [#allocation6], 1 }
 0x277   :  { %428 = vsyncpa [#allocation6 + $0x1], 1 }
 0x278   :  { %429 = vsyncpa [#allocation9], 1 }
 0x279   :  { %431 = vsyncpa [#allocation9 + $0x1], 1 }
 0x27a   :  { %432 = vsyncpa [#allocation7], 1 }
 0x27b   :  { %434 = vsyncpa [#allocation7 + $0x1], 1 }
 0x27c   :  { %435 = vsyncmov [#allocation4] }
 0x27f   :  { %s436_s4 = vpop.sfrf %435 }
 0x280   :  { %p540_p8 = scmp.ne.s32.totalorder %s436_s4, 0 }
 0x282   :  { %440 = shalt.err (%p540_p8)  }

</bundles_post_ra>
